<compile_context>
chip_gen: v6e
topology: v6e:2x2x1
jax: 0.10.0
libtpu: 0.0.40
codegen_flags: <defaults>
</compile_context>

<pallas_src>
import jax
import jax.numpy as jnp
from jax.experimental import pallas as pl
from jax.experimental.pallas import tpu as pltpu


def _make_normalize_kernel(r_tile, num_row_blocks):
    def kernel(sb_ref, x_ref, o_ref):
        # sb_ref: (R_pad, 2) f32 resident [scale | bias]; x/o: (r_tile, hw_tile).
        if num_row_blocks == 1:
            sb = sb_ref[...]                                   # fully static path
        else:
            # r_tile is a multiple of the dtype sublane count here, so the
            # dynamic slice start is sublane-aligned.
            row0 = pl.multiple_of(pl.program_id(0) * r_tile, r_tile)
            sb = sb_ref[pl.ds(row0, r_tile), :]
        scale = sb[:, 0:1]
        bias = sb[:, 1:2]
        # Compute in f32, cast only the final result (single rounding step).
        x = x_ref[...].astype(jnp.float32)
        o_ref[...] = (x * scale + bias).astype(o_ref.dtype)

    return kernel


def _pick_tiles(R, HW, itemsize, target_block_bytes):
    LANE = 128
    sub = {4: 8, 2: 16, 1: 32}.get(itemsize, 8)   # dtype-native sublane multiple

    # Lane (last-dim) tile: full H*W when a sub-row slab of it fits the budget,
    # otherwise the largest multiple of 128 under the per-(sub rows) budget,
    # preferring a divisor of H*W so the tail block stays lane-dense/unmasked.
    if HW <= LANE or HW * itemsize * sub <= target_block_bytes:
        hw_tile = HW
    else:
        budget_lanes = max(LANE, (target_block_bytes // (sub * itemsize)) // LANE * LANE)
        hw_tile = 0
        d = min(budget_lanes, (HW // LANE) * LANE)
        while d >= LANE:
            if HW % d == 0:
                hw_tile = d
                break
            d -= LANE
        if hw_tile == 0:
            hw_tile = budget_lanes

    # Sublane (second-to-last dim) tile: joint accounting so the actual block
    # satisfies r_tile * hw_tile * itemsize <= target_block_bytes.
    budget_rows = max(1, target_block_bytes // (hw_tile * itemsize))
    if budget_rows >= R:
        r_tile = R
    else:
        r_tile = max(sub, (budget_rows // sub) * sub)

    # v7x has 2 TensorCores: make sure a "large" single-block case still yields
    # >= 2 blocks along a parallel axis so both cores get work.
    if r_tile >= R and hw_tile >= HW and R * HW * itemsize > (1 << 20):
        if R >= 2 * sub:
            r_tile = max(sub, ((R // 2) // sub) * sub)
        elif HW >= 2 * LANE:
            hw_tile = max(LANE, ((HW // 2) // LANE) * LANE)

    return r_tile, hw_tile, sub


def normalize(x, mean, std, *, target_block_bytes=2 << 20):
    """(x - mean[None,:,None,None]) / std[None,:,None,None] for NCHW x."""
    N, C, H, W = x.shape
    R = N * C
    HW = H * W
    itemsize = jnp.dtype(x.dtype).itemsize

    r_tile, hw_tile, _sub = _pick_tiles(R, HW, itemsize, target_block_bytes)
    grid = (pl.cdiv(R, r_tile), pl.cdiv(HW, hw_tile))
    num_rb, _num_cb = grid
    R_pad = num_rb * r_tile        # pad rows so in-kernel slices never go OOB

    # Fold (x - mean)/std into x * scale + bias (f32 so low-precision inputs
    # round only once, at the final cast), packed as one resident (R_pad, 2).
    scale_c = 1.0 / jnp.asarray(std, jnp.float32)        # (C,)
    bias_c = -jnp.asarray(mean, jnp.float32) * scale_c   # (C,)
    scale_r = jnp.tile(scale_c, N)                       # (R,)
    bias_r = jnp.tile(bias_c, N)                         # (R,)
    if R_pad > R:
        scale_r = jnp.concatenate([scale_r, jnp.ones((R_pad - R,), jnp.float32)])
        bias_r = jnp.concatenate([bias_r, jnp.zeros((R_pad - R,), jnp.float32)])
    sb = jnp.stack([scale_r, bias_r], axis=1)            # (R_pad, 2) f32

    # Flatten spatial dims so the last (lane) axis is dense.
    x2 = x.reshape(R, HW)

    block_bytes = r_tile * hw_tile * itemsize
    # ~4x block for x+o double buffers plus slack; well under physical VMEM on
    # v5e/v6e (128 MiB) and v7x (64 MiB).
    vmem_limit = int(min(64 << 20, max(32 << 20, 6 * block_bytes)))

    kernel = _make_normalize_kernel(r_tile, num_rb)

    out2 = pl.pallas_call(
        kernel,
        out_shape=jax.ShapeDtypeStruct((R, HW), x.dtype),
        grid=grid,
        in_specs=[
            pl.BlockSpec((R_pad, 2), lambda i, j: (0, 0)),         # resident scale|bias
            pl.BlockSpec((r_tile, hw_tile), lambda i, j: (i, j)),  # x
        ],
        out_specs=pl.BlockSpec((r_tile, hw_tile), lambda i, j: (i, j)),
        compiler_params=pltpu.CompilerParams(
            dimension_semantics=("parallel", "parallel"),
            vmem_limit_bytes=vmem_limit,
        ),
        cost_estimate=pl.CostEstimate(
            flops=2 * R * HW,
            transcendentals=0,
            bytes_accessed=2 * R * HW * itemsize + R_pad * 2 * 4,
        ),
    )(sb, x2)

    return out2.reshape(N, C, H, W)


if __name__ == "__main__":
    key = jax.random.PRNGKey(0)
    # ImageNet-style 3-channel input (matches the module's default buffers).
    x = jax.random.uniform(key, (2, 3, 16, 16), dtype=jnp.float32)

    mean = jnp.array([0.485, 0.456, 0.406], dtype=jnp.float32)
    std = jnp.array([0.229, 0.224, 0.225], dtype=jnp.float32)

    out = jax.block_until_ready(normalize(x, mean, std))

    # Reference check (plain JAX, same broadcasting as the PyTorch module).
    ref = (x - mean[None, :, None, None]) / std[None, :, None, None]
    assert out.shape == x.shape
    assert jnp.allclose(out, ref, atol=1e-5, rtol=1e-5)

    print("KERNEL_OK")
</pallas_src>

<mosaic_0001>
module attributes {stable_mosaic.version = 11 : i64} {
  func.func @kernel(%arg0: i32, %arg1: i32, %arg2: memref<6x2xf32, #tpu.memory_space<vmem>>, %arg3: memref<6x256xf32, #tpu.memory_space<vmem>>, %arg4: memref<6x256xf32, #tpu.memory_space<vmem>>) attributes {dimension_semantics = [#tpu.dimension_semantics<parallel>, #tpu.dimension_semantics<parallel>], iteration_bounds = array<i64: 1, 1>, scalar_prefetch = 0 : i64, scratch_operands = 0 : i64, tpu.core_type = #tpu.core_type<tc>, window_params = [{pipeline_mode = #tpu.pipeline_mode<synchronous>, transform_indices = @transform_0, window_bounds = array<i64: 6, 2>}, {transform_indices = @transform_1, window_bounds = array<i64: 6, 256>}, {transform_indices = @transform_2, window_bounds = array<i64: 6, 256>}]} {
    %c0 = arith.constant 0 : index
    %c0_0 = arith.constant 0 : index
    %0 = vector.load %arg2[%c0, %c0_0] : memref<6x2xf32, #tpu.memory_space<vmem>>, vector<6x2xf32>
    %1 = vector.extract_strided_slice %0 {offsets = [0, 0], sizes = [6, 1], strides = [1, 1]} : vector<6x2xf32> to vector<6x1xf32>
    %2 = vector.extract_strided_slice %0 {offsets = [0, 1], sizes = [6, 1], strides = [1, 1]} : vector<6x2xf32> to vector<6x1xf32>
    %c0_1 = arith.constant 0 : index
    %c0_2 = arith.constant 0 : index
    %3 = vector.load %arg3[%c0_1, %c0_2] : memref<6x256xf32, #tpu.memory_space<vmem>>, vector<6x256xf32>
    %4 = vector.broadcast %1 : vector<6x1xf32> to vector<6x256xf32>
    %5 = arith.mulf %3, %4 : vector<6x256xf32>
    %6 = vector.broadcast %2 : vector<6x1xf32> to vector<6x256xf32>
    %7 = arith.addf %5, %6 : vector<6x256xf32>
    %c0_3 = arith.constant 0 : index
    %c0_4 = arith.constant 0 : index
    %8 = vector.load %arg4[%c0_3, %c0_4] : memref<6x256xf32, #tpu.memory_space<vmem>>, vector<6x256xf32>
    tpu.vector_store %arg4[%c0_3, %c0_4], %7 {strides = array<i32>} : memref<6x256xf32, #tpu.memory_space<vmem>>, vector<6x256xf32>,
    return
  }
  func.func @transform_0(%arg0: i32, %arg1: i32) -> (i32, i32) {
    %c0_i32 = arith.constant 0 : i32
    %c0_i32_0 = arith.constant 0 : i32
    %c0_i32_1 = arith.constant 0 : i32
    return %c0_i32, %c0_i32_0 : i32, i32
  }
  func.func @transform_1(%arg0: i32, %arg1: i32) -> (i32, i32) {
    %c0_i32 = arith.constant 0 : i32
    return %arg0, %arg1 : i32, i32
  }
  func.func @transform_2(%arg0: i32, %arg1: i32) -> (i32, i32) {
    %c0_i32 = arith.constant 0 : i32
    return %arg0, %arg1 : i32, i32
  }
}

</mosaic_0001>

<bundles_post_ra>
// kernel: tpu_custom_call.1
= control target key start
LH: loop header
LB: loop body
LE: loop exit
PB: predicated region body
PF: predicated region fallthrough
CT: control target
= control target key end

     0   :  { %7 = vsyncpa [#allocation3], 0  ;;  %s135_s0 = inlined_call_operand.vmem [shape: f32[6,2], index: 0, kind: input, shape index: {}]   ;;  %s136_s1 = inlined_call_operand.hbm [shape: f32[6,256], index: 1, kind: input, shape index: {}]   ;;  %s137_s2 = inlined_call_operand.hbm [shape: f32[6,256], index: 2, kind: output, shape index: {}]  }
   0x1   :  { %8 = vsyncpa [#allocation4], 0  ;;  %s107_s9 = smov [#allocation2]  }
   0x2   :  { %s17_s10 = sshll.u32 %s107_s9, 4  ;;  %s18_s10 = int_to_ptr.vmem [resolvable:$true] %s17_s10 }
   0x3   :  { %s71_s11 = scalar_lea.vmem %s18_s10, 256  ;;  %p76_p1 = scmp.lt.s32.totalorder %s18_s10, %s18_s10 }
   0x4   :  { %p72_p0 = scmp.ne.s32.totalorder %s18_s10, %s71_s11  ;;  %p77_p2 = scmp.lt.s32.totalorder %s71_s11, %s71_s11 }
   0x6   :  { %p78_p3 = por %p77_p2, %p76_p1 }
   0x8   :  { %p79_p4 = pnand %p78_p3, %p72_p0 }
   0xa   :  { %82 = shalt.err (!%p79_p4)
}
   0xb   :  { %20 = dma.hbm_to_vmem [thread:$0]  %s136_s1, 256, %s18_s10, [#allocation3]  }
   0xc   :  { %103 = dma.done.wait [#allocation3], 256  }
   0xd   :  { %104 = vsyncadd [#allocation3], 4294967040  ;;  %v108_v0 = vmov 0   ;;  %v24_v1 = vld [vmem:[%s135_s0] sm:$0x3f]  ;;  %v109_v2 = vmov 1  }
   0xe   :  { %61 = vset.pattern.permute.xlu0 %v108_v0  ;;  %v25_v4 = vld [vmem:[#allocation2] sm:$0x3f]  ;;  %v26_v5 = vld [vmem:[#allocation2 + $0x8] sm:$0x3f]  ;;  %s110_s16 = smov [#allocation5]  }
   0xf   :  { %29 = vperm.xlu0 %61, %v24_v1   ;;  %s48_s17 = sshll.u32 %s110_s16, 4  ;;  %s49_s17 = int_to_ptr.vmem [resolvable:$true] %s48_s17 }
  0x10   :  { %s83_s1 = scalar_lea.vmem %s49_s17, 256  ;;  %p88_p6 = scmp.lt.s32.totalorder %s49_s17, %s49_s17 }
  0x11   :  { %p84_p5 = scmp.ne.s32.totalorder %s49_s17, %s83_s1  ;;  %p89_p7 = scmp.lt.s32.totalorder %s83_s1, %s83_s1 }
  0x13   :  { %62 = vset.pattern.permute.xlu0 %v109_v2  ;;  %p90_p8 = por %p89_p7, %p88_p6 }
  0x14   :  { %35 = vperm.xlu0 %62, %v24_v1  }
  0x15   :  { %p91_p9 = pnand %p90_p8, %p84_p5 }
  0x8a   :  { %v30_v3 = vpop.permute.xlu0 %29 }
  0x8b   :  { %v32_v6 = vmul.f32 %v30_v3, %v25_v4  ;;  %v33_v7 = vmul.f32 %v30_v3, %v26_v5 }
  0x8f   :  { %v36_v8 = vpop.permute.xlu0 %35 }
  0x90   :  { %v38_v9 = vadd.f32 %v36_v8, %v32_v6  ;;  %v39_v10 = vadd.f32 %v36_v8, %v33_v7 }
  0x92   :  { %40 = vst [vmem:[#allocation5] sm:$0x3f] %v38_v9  ;;  %41 = vst [vmem:[#allocation5 + $0x8] sm:$0x3f] %v39_v10 }
  0x93   :  { %94 = shalt.err (!%p91_p9)
}
  0x94   :  { %51 = dma.vmem_to_hbm [thread:$0]  %s49_s17, 256, %s137_s2, [#allocation4]  }
  0x95   :  { %105 = dma.done.wait [#allocation4], 256  }
  0x96   :  { %106 = vsyncadd [#allocation4], 4294967040 }
  0x97   :  { %55 = vsyncpa [#allocation3], 1 }
  0x98   :  { %56 = vsyncpa [#allocation4], 1 }

</bundles_post_ra>
